<compile_context>
chip_gen: v7x
topology: tpu7x:2x2x1
jax: 0.10.0
libtpu: 0.0.40
codegen_flags: <defaults>
</compile_context>

<pallas_src>
import functools

import jax
import jax.numpy as jnp
from jax.experimental import pallas as pl
from jax.experimental.pallas import tpu as pltpu

INPUT_DIM = 28 * 28  # hardcoded in the PyTorch module


def _round_up(x: int, m: int) -> int:
    return ((x + m - 1) // m) * m


def make_net_kernel(deg: int):
    def net_kernel(x_ref, x1t_ref, w1t_ref, b1_ref, wft_ref, bf_ref, o_ref):
        # --- getkernel: inner = (x @ x1.T) * 1e-3 ; ans = inner + 0.001 + sum_{i=2..deg} inner**i
        inner = jnp.dot(x_ref[...], x1t_ref[...],
                        preferred_element_type=jnp.float32) * 1e-3
        ans = inner + 0.001
        p = inner
        for _ in range(2, deg + 1):        # deg is Python-static -> unrolled, running product
            p = p * inner
            ans = ans + p

        # --- output1 = relu(linear1(kernel1))   (W1 pre-transposed to (in, out) in wrapper)
        h = jnp.dot(ans, w1t_ref[...], preferred_element_type=jnp.float32) + b1_ref[...]
        h = jnp.maximum(h, 0.0)

        # --- logits = fc(output1)               (Wf pre-transposed to (in, out) in wrapper)
        logits = jnp.dot(h, wft_ref[...], preferred_element_type=jnp.float32) + bf_ref[...]

        # --- log_softmax over the (lane-padded) last dim.  Padded lanes carry a -1e30
        #     bias, so they never win the max and exp() underflows to 0.
        m = jnp.max(logits, axis=-1, keepdims=True)
        shifted = logits - m
        lse = jnp.log(jnp.sum(jnp.exp(shifted), axis=-1, keepdims=True))
        o_ref[...] = shifted - lse

    return net_kernel


def prepare_net_params(x1, w1, b1, wf, bf):
    """One-time setup: cast to f32, transpose weights to (in, out) MXU-native layout
    and pad the small feature dims to lane multiples of 128.

    NOTE on padding correctness: padded x1 columns make `ans` equal 0.001 (not 0) in
    those columns, which is harmless only because the corresponding W1^T rows are zero;
    padded logit lanes are forced to -1e30 via the padded bias so log_softmax ignores
    them.  Keep the zero / -1e30 padding if this function is ever changed.
    """
    M, K = x1.shape
    n_out = wf.shape[0]
    Mp = _round_up(M, 128)
    Np = _round_up(n_out, 128)
    f32 = jnp.float32

    x1t = jnp.zeros((K, Mp), f32).at[:, :M].set(x1.astype(f32).T)          # (K, Mp)
    w1t = jnp.zeros((Mp, Mp), f32).at[:M, :M].set(w1.astype(f32).T)        # (Mp, Mp)
    b1p = jnp.zeros((1, Mp), f32).at[:, :M].set(b1.astype(f32).reshape(1, -1))
    wft = jnp.zeros((Mp, Np), f32).at[:M, :n_out].set(wf.astype(f32).T)    # (Mp, Np)
    bfp = jnp.full((1, Np), -1e30, f32).at[:, :n_out].set(bf.astype(f32).reshape(1, -1))

    return {"x1t": x1t, "w1t": w1t, "b1": b1p, "wft": wft, "bf": bfp}


def net_forward(x, params, *, n_out=10, deg=3, block_b=512):
    """Forward pass.  `params` must come from prepare_net_params (pre-padded, resident)."""
    x1t, w1t, b1, wft, bf = (params["x1t"], params["w1t"], params["b1"],
                             params["wft"], params["bf"])
    B, K = x.shape
    Kw, Mp = x1t.shape
    assert K == Kw, "feature dim of x must match x1"
    Np = wft.shape[1]

    # Batch tile: sublane-aligned and as large as block_b (fewer grid steps amortize the
    # ~0.35us per-step overhead and give the MXU a bigger M), but capped so the
    # "parallel" batch axis keeps >= 2 grid steps when B allows it -> both v7x
    # TensorCores get work (no effect on v5e/v6e, which have a single TC).
    B8 = _round_up(B, 8)
    if B8 >= 16:
        TB = min(block_b, _round_up((B8 + 1) // 2, 8))
    else:
        TB = B8
    Bp = _round_up(B, TB)

    xf = x.astype(jnp.float32)
    xp = xf if Bp == B else jnp.zeros((Bp, K), jnp.float32).at[:B].set(xf)

    # Advisory cost hint for XLA's scheduler around the custom call.
    flops = (2 * Bp * K * Mp            # kernel matmul
             + 2 * Bp * Mp * Mp         # linear1
             + 2 * Bp * Mp * Np         # fc
             + (2 * (deg - 1) + 8) * Bp * Mp)   # polynomial + relu + softmax elementwise
    transcendentals = Bp * (Np + 1)     # exp per logit lane + log per row
    bytes_accessed = 4 * (Bp * K + K * Mp + Mp * Mp + Mp + Mp * Np + Np + Bp * Np)

    grid = (Bp // TB,)
    out_p = pl.pallas_call(
        make_net_kernel(deg),
        out_shape=jax.ShapeDtypeStruct((Bp, Np), jnp.float32),
        grid=grid,
        in_specs=[
            pl.BlockSpec((TB, K), lambda i: (i, 0)),    # x    : streamed over batch, K unpadded (full extent)
            pl.BlockSpec((K, Mp), lambda i: (0, 0)),    # x1^T : resident
            pl.BlockSpec((Mp, Mp), lambda i: (0, 0)),   # W1^T : resident
            pl.BlockSpec((1, Mp), lambda i: (0, 0)),    # b1   : resident
            pl.BlockSpec((Mp, Np), lambda i: (0, 0)),   # Wf^T : resident
            pl.BlockSpec((1, Np), lambda i: (0, 0)),    # bf   : resident (-1e30 in padded lanes)
        ],
        out_specs=pl.BlockSpec((TB, Np), lambda i: (i, 0)),
        compiler_params=pltpu.CompilerParams(
            dimension_semantics=("parallel",),          # v7x: 2 TCs split the batch axis
        ),
        cost_estimate=pl.CostEstimate(
            flops=flops,
            transcendentals=transcendentals,
            bytes_accessed=bytes_accessed,
        ),
    )(xp, x1t, w1t, b1, wft, bf)

    return out_p[:B, :n_out]


def reference_forward(x, x1, w1, b1, wf, bf, *, deg=3):
    inner = (x @ x1.T) / 1000.0
    ans = inner + 0.001
    for i in range(2, deg + 1):
        ans = ans + inner ** i
    h = jnp.maximum(ans @ w1.T + b1, 0.0)
    logits = h @ wf.T + bf
    return jax.nn.log_softmax(logits, axis=-1)


if __name__ == "__main__":
    B = 8          # batch
    M = 32         # args.m
    DEG = 3        # polynomial kernel degree
    N_OUT = 10

    key = jax.random.PRNGKey(0)
    k_x, k_x1, k_w1, k_b1, k_wf, k_bf = jax.random.split(key, 6)

    # Inputs
    x = jax.random.normal(k_x, (B, INPUT_DIM), dtype=jnp.float32)
    x1 = jax.random.normal(k_x1, (M, INPUT_DIM), dtype=jnp.float32)

    # Deterministic parameter init (PyTorch-style uniform(-1/sqrt(fan_in), 1/sqrt(fan_in)))
    bound1 = 1.0 / jnp.sqrt(jnp.float32(M))
    w1 = jax.random.uniform(k_w1, (M, M), jnp.float32, -bound1, bound1)
    b1 = jax.random.uniform(k_b1, (1, M), jnp.float32, -bound1, bound1)
    boundf = 1.0 / jnp.sqrt(jnp.float32(M))
    wf = jax.random.uniform(k_wf, (N_OUT, M), jnp.float32, -boundf, boundf)
    bf = jax.random.uniform(k_bf, (1, N_OUT), jnp.float32, -boundf, boundf)

    # One-time parameter preparation (padding/transposition hoisted out of the call path).
    params = jax.tree_util.tree_map(jax.block_until_ready,
                                    prepare_net_params(x1, w1, b1, wf, bf))

    fwd = jax.jit(functools.partial(net_forward, n_out=N_OUT, deg=DEG))
    out = jax.block_until_ready(fwd(x, params))

    ref = reference_forward(x, x1, w1, b1, wf, bf, deg=DEG)
    assert out.shape == (B, N_OUT)
    assert jnp.allclose(out, ref, atol=1e-4, rtol=1e-4), "mismatch vs JAX reference"

    print("KERNEL_OK")
</pallas_src>

<mosaic_0001>
module attributes {stable_mosaic.version = 11 : i64} {
  func.func @net_kernel(%arg0: i32, %arg1: memref<8x784xf32, #tpu.memory_space<vmem>>, %arg2: memref<784x128xf32, #tpu.memory_space<vmem>>, %arg3: memref<128x128xf32, #tpu.memory_space<vmem>>, %arg4: memref<1x128xf32, #tpu.memory_space<vmem>>, %arg5: memref<128x128xf32, #tpu.memory_space<vmem>>, %arg6: memref<1x128xf32, #tpu.memory_space<vmem>>, %arg7: memref<8x128xf32, #tpu.memory_space<vmem>>) attributes {dimension_semantics = [#tpu.dimension_semantics<parallel>], iteration_bounds = array<i64: 1>, scalar_prefetch = 0 : i64, scratch_operands = 0 : i64, tpu.core_type = #tpu.core_type<tc>, window_params = [{transform_indices = @transform_0, window_bounds = array<i64: 8, 784>}, {pipeline_mode = #tpu.pipeline_mode<synchronous>, transform_indices = @transform_1, window_bounds = array<i64: 784, 128>}, {pipeline_mode = #tpu.pipeline_mode<synchronous>, transform_indices = @transform_2, window_bounds = array<i64: 128, 128>}, {pipeline_mode = #tpu.pipeline_mode<synchronous>, transform_indices = @transform_3, window_bounds = array<i64: 1, 128>}, {pipeline_mode = #tpu.pipeline_mode<synchronous>, transform_indices = @transform_4, window_bounds = array<i64: 128, 128>}, {pipeline_mode = #tpu.pipeline_mode<synchronous>, transform_indices = @transform_5, window_bounds = array<i64: 1, 128>}, {transform_indices = @transform_6, window_bounds = array<i64: 8, 128>}]} {
    %c0 = arith.constant 0 : index
    %c0_0 = arith.constant 0 : index
    %0 = vector.load %arg1[%c0, %c0_0] : memref<8x784xf32, #tpu.memory_space<vmem>>, vector<8x784xf32>
    %c0_1 = arith.constant 0 : index
    %c0_2 = arith.constant 0 : index
    %1 = vector.load %arg2[%c0_1, %c0_2] : memref<784x128xf32, #tpu.memory_space<vmem>>, vector<784x128xf32>
    %cst = arith.constant dense<0.000000e+00> : vector<8x128xf32>
    %2 = tpu.matmul %0, %1, %cst {dimension_numbers = #tpu.dot_dimension_numbers<[1], [0], [0], [1], [0, 0, 1, 1], [], []>} : vector<8x784xf32>, vector<784x128xf32>, vector<8x128xf32> -> vector<8x128xf32>
    %cst_3 = arith.constant 1.000000e-03 : f32
    %3 = vector.broadcast %cst_3 : f32 to vector<8x128xf32>
    %4 = arith.mulf %2, %3 : vector<8x128xf32>
    %cst_4 = arith.constant 1.000000e-03 : f32
    %5 = vector.broadcast %cst_4 : f32 to vector<8x128xf32>
    %6 = arith.addf %4, %5 : vector<8x128xf32>
    %7 = arith.mulf %4, %4 : vector<8x128xf32>
    %8 = arith.addf %6, %7 : vector<8x128xf32>
    %9 = arith.mulf %7, %4 : vector<8x128xf32>
    %10 = arith.addf %8, %9 : vector<8x128xf32>
    %c0_5 = arith.constant 0 : index
    %c0_6 = arith.constant 0 : index
    %11 = vector.load %arg3[%c0_5, %c0_6] : memref<128x128xf32, #tpu.memory_space<vmem>>, vector<128x128xf32>
    %cst_7 = arith.constant dense<0.000000e+00> : vector<8x128xf32>
    %12 = tpu.matmul %10, %11, %cst_7 {dimension_numbers = #tpu.dot_dimension_numbers<[1], [0], [0], [1], [0, 0, 1, 1], [], []>} : vector<8x128xf32>, vector<128x128xf32>, vector<8x128xf32> -> vector<8x128xf32>
    %c0_8 = arith.constant 0 : index
    %c0_9 = arith.constant 0 : index
    %13 = vector.load %arg4[%c0_8, %c0_9] : memref<1x128xf32, #tpu.memory_space<vmem>>, vector<1x128xf32>
    %14 = vector.broadcast %13 : vector<1x128xf32> to vector<8x128xf32>
    %15 = arith.addf %12, %14 : vector<8x128xf32>
    %cst_10 = arith.constant 0.000000e+00 : f32
    %16 = vector.broadcast %cst_10 : f32 to vector<8x128xf32>
    %17 = arith.maximumf %15, %16 : vector<8x128xf32>
    %c0_11 = arith.constant 0 : index
    %c0_12 = arith.constant 0 : index
    %18 = vector.load %arg5[%c0_11, %c0_12] : memref<128x128xf32, #tpu.memory_space<vmem>>, vector<128x128xf32>
    %cst_13 = arith.constant dense<0.000000e+00> : vector<8x128xf32>
    %19 = tpu.matmul %17, %18, %cst_13 {dimension_numbers = #tpu.dot_dimension_numbers<[1], [0], [0], [1], [0, 0, 1, 1], [], []>} : vector<8x128xf32>, vector<128x128xf32>, vector<8x128xf32> -> vector<8x128xf32>
    %c0_14 = arith.constant 0 : index
    %c0_15 = arith.constant 0 : index
    %20 = vector.load %arg6[%c0_14, %c0_15] : memref<1x128xf32, #tpu.memory_space<vmem>>, vector<1x128xf32>
    %21 = vector.broadcast %20 : vector<1x128xf32> to vector<8x128xf32>
    %22 = arith.addf %19, %21 : vector<8x128xf32>
    %cst_16 = arith.constant dense<0xFF800000> : vector<8xf32>
    %23 = vector.multi_reduction <maximumf>, %22, %cst_16 [1] : vector<8x128xf32> to vector<8xf32>
    %24 = vector.shape_cast %23 : vector<8xf32> to vector<8x1xf32>
    %25 = vector.broadcast %24 : vector<8x1xf32> to vector<8x128xf32>
    %26 = arith.subf %22, %25 : vector<8x128xf32>
    %27 = math.exp %26 : vector<8x128xf32>
    %cst_17 = arith.constant dense<0.000000e+00> : vector<8xf32>
    %28 = vector.multi_reduction <add>, %27, %cst_17 [1] : vector<8x128xf32> to vector<8xf32>
    %29 = vector.shape_cast %28 : vector<8xf32> to vector<8x1xf32>
    %30 = math.log %29 : vector<8x1xf32>
    %31 = vector.broadcast %30 : vector<8x1xf32> to vector<8x128xf32>
    %32 = arith.subf %26, %31 : vector<8x128xf32>
    %c0_18 = arith.constant 0 : index
    %c0_19 = arith.constant 0 : index
    %33 = vector.load %arg7[%c0_18, %c0_19] : memref<8x128xf32, #tpu.memory_space<vmem>>, vector<8x128xf32>
    tpu.vector_store %arg7[%c0_18, %c0_19], %32 {strides = array<i32>} : memref<8x128xf32, #tpu.memory_space<vmem>>, vector<8x128xf32>,
    return
  }
  func.func @transform_0(%arg0: i32) -> (i32, i32) {
    %c0_i32 = arith.constant 0 : i32
    %c0_i32_0 = arith.constant 0 : i32
    return %arg0, %c0_i32 : i32, i32
  }
  func.func @transform_1(%arg0: i32) -> (i32, i32) {
    %c0_i32 = arith.constant 0 : i32
    %c0_i32_0 = arith.constant 0 : i32
    %c0_i32_1 = arith.constant 0 : i32
    return %c0_i32, %c0_i32_0 : i32, i32
  }
  func.func @transform_2(%arg0: i32) -> (i32, i32) {
    %c0_i32 = arith.constant 0 : i32
    %c0_i32_0 = arith.constant 0 : i32
    %c0_i32_1 = arith.constant 0 : i32
    return %c0_i32, %c0_i32_0 : i32, i32
  }
  func.func @transform_3(%arg0: i32) -> (i32, i32) {
    %c0_i32 = arith.constant 0 : i32
    %c0_i32_0 = arith.constant 0 : i32
    %c0_i32_1 = arith.constant 0 : i32
    return %c0_i32, %c0_i32_0 : i32, i32
  }
  func.func @transform_4(%arg0: i32) -> (i32, i32) {
    %c0_i32 = arith.constant 0 : i32
    %c0_i32_0 = arith.constant 0 : i32
    %c0_i32_1 = arith.constant 0 : i32
    return %c0_i32, %c0_i32_0 : i32, i32
  }
  func.func @transform_5(%arg0: i32) -> (i32, i32) {
    %c0_i32 = arith.constant 0 : i32
    %c0_i32_0 = arith.constant 0 : i32
    %c0_i32_1 = arith.constant 0 : i32
    return %c0_i32, %c0_i32_0 : i32, i32
  }
  func.func @transform_6(%arg0: i32) -> (i32, i32) {
    %c0_i32 = arith.constant 0 : i32
    %c0_i32_0 = arith.constant 0 : i32
    return %arg0, %c0_i32 : i32, i32
  }
}

</mosaic_0001>

<bundles_post_ra>
// kernel: net_forward.1
= control target key start
LH: loop header
LB: loop body
LE: loop exit
PB: predicated region body
PF: predicated region fallthrough
CT: control target
= control target key end

     0   :  { %11 = vsyncpa [#allocation3], 0  ;;  %s1328_s0 = inlined_call_operand.hbm [shape: f32[8,784], index: 0, kind: input, shape index: {}]   ;;  %s1329_s1 = inlined_call_operand.hbm [shape: f32[784,128], index: 1, kind: input, shape index: {}]   ;;  %s1330_s2 = inlined_call_operand.hbm [shape: f32[128,128], index: 2, kind: input, shape index: {}]   ;;  %s1331_s3 = inlined_call_operand.vmem [shape: f32[1,128], index: 3, kind: input, shape index: {}]   ;;  %s1332_s4 = inlined_call_operand.hbm [shape: f32[128,128], index: 4, kind: input, shape index: {}]   ;;  %s1333_s5 = inlined_call_operand.vmem [shape: f32[1,128], index: 5, kind: input, shape index: {}]   ;;  %s1334_s6 = inlined_call_operand.hbm [shape: f32[8,128], index: 6, kind: output, shape index: {}]  }
   0x1   :  { %12 = vsyncpa [#allocation6], 0 }
   0x2   :  { %13 = vsyncpa [#allocation9], 0 }
   0x3   :  { %14 = vsyncpa [#allocation4], 0  ;;  %s1188_s21 = smov [#allocation5]   ;;  %s1070_s25 = scalar_lea.hbm %s1329_s1, 12544 }
   0x4   :  { %s30_s22 = sshll.u32 %s1188_s21, 4  ;;  %p1071_p0 = scmp.ne.s32.totalorder %s1329_s1, %s1070_s25  ;;  %s31_s22 = int_to_ptr.vmem [resolvable:$true] %s30_s22 }
   0x5   :  { %p1074_p1 = scmp.lt.u32.totalorder %s1070_s25, %s1329_s1 }
   0x7   :  { %p1076_p2 = pnand %p1074_p1, %p1071_p0 }
   0x9   :  { %1079 = shalt.err (!%p1076_p2)
}
   0xa   :  { %s1080_s30 = scalar_lea.vmem %s31_s22, 12544  ;;  %p1085_p4 = scmp.lt.s32.totalorder %s31_s22, %s31_s22 }
   0xb   :  { %p1081_p3 = scmp.ne.s32.totalorder %s31_s22, %s1080_s30  ;;  %p1086_p5 = scmp.lt.s32.totalorder %s1080_s30, %s1080_s30 }
   0xd   :  { %p1087_p6 = por %p1086_p5, %p1085_p4 }
   0xf   :  { %p1088_p7 = pnand %p1087_p6, %p1081_p3 }
  0x11   :  { %1091 = shalt.err (!%p1088_p7)
}
  0x12   :  { %s1189_s7 = smov 128   ;;  %s1190_s8 = smov 8  }
  0x13   :  { %36 = dma.hbm_to_vmem [thread:$0]  %s1329_s1, 12544, %s31_s22, [#allocation6], %s1189_s7, %s1189_s7, %s1190_s8  }
  0x14   :  { %s1191_s11 = smov [#allocation2]   ;;  %s1192_s13 = smov [#allocation7]  }
  0x15   :  { %s21_s12 = sshll.u32 %s1191_s11, 4  ;;  %s42_s14 = sshll.u32 %s1192_s13, 4  ;;  %s22_s12 = int_to_ptr.vmem [resolvable:$true] %s21_s12  ;;  %s43_s14 = int_to_ptr.vmem [resolvable:$true] %s42_s14 }
  0x16   :  { %s1092_s17 = scalar_lea.hbm %s1328_s0, 896 }
  0x17   :  { %p1093_p8 = scmp.ne.s32.totalorder %s1328_s0, %s1092_s17  ;;  %p1096_p9 = scmp.lt.u32.totalorder %s1092_s17, %s1328_s0 }
  0x19   :  { %p1098_p10 = pnand %p1096_p9, %p1093_p8 }
  0x1b   :  { %1101 = shalt.err (!%p1098_p10)
}
  0x1c   :  { %s1102_s1 = scalar_lea.vmem %s22_s12, 896  ;;  %p1107_p12 = scmp.lt.s32.totalorder %s22_s12, %s22_s12 }
  0x1d   :  { %p1103_p11 = scmp.ne.s32.totalorder %s22_s12, %s1102_s1  ;;  %p1108_p13 = scmp.lt.s32.totalorder %s1102_s1, %s1102_s1 }
  0x1f   :  { %p1109_p0 = por %p1108_p13, %p1107_p12 }
  0x21   :  { %p1110_p1 = pnand %p1109_p0, %p1103_p11 }
  0x23   :  { %1113 = shalt.err (!%p1110_p1)
}
  0x24   :  { %24 = dma.hbm_to_vmem [thread:$0]  %s1328_s0, 896, %s22_s12, [#allocation3]  }
  0x25   :  { %s1114_s26 = scalar_lea.hbm %s1330_s2, 2048 }
  0x26   :  { %p1115_p2 = scmp.ne.s32.totalorder %s1330_s2, %s1114_s26  ;;  %p1118_p3 = scmp.lt.u32.totalorder %s1114_s26, %s1330_s2 }
  0x28   :  { %p1120_p4 = pnand %p1118_p3, %p1115_p2 }
  0x2a   :  { %1123 = shalt.err (!%p1120_p4)
}
  0x2b   :  { %s1124_s9 = scalar_lea.vmem %s43_s14, 2048  ;;  %p1129_p6 = scmp.lt.s32.totalorder %s43_s14, %s43_s14 }
  0x2c   :  { %p1125_p5 = scmp.ne.s32.totalorder %s43_s14, %s1124_s9  ;;  %p1130_p7 = scmp.lt.s32.totalorder %s1124_s9, %s1124_s9 }
  0x2e   :  { %p1131_p8 = por %p1130_p7, %p1129_p6 }
  0x30   :  { %p1132_p9 = pnand %p1131_p8, %p1125_p5 }
  0x32   :  { %1135 = shalt.err (!%p1132_p9)
}
  0x33   :  { %48 = dma.hbm_to_vmem [thread:$0]  %s1330_s2, 2048, %s43_s14, [#allocation6], %s1189_s7, %s1189_s7, %s1190_s8  }
  0x34   :  { %s1193_s11 = smov [#allocation8]   ;;  %s1136_s16 = scalar_lea.hbm %s1332_s4, 2048 }
  0x35   :  { %s56_s12 = sshll.u32 %s1193_s11, 4  ;;  %p1137_p10 = scmp.ne.s32.totalorder %s1332_s4, %s1136_s16  ;;  %s57_s12 = int_to_ptr.vmem [resolvable:$true] %s56_s12 }
  0x36   :  { %p1140_p11 = scmp.lt.u32.totalorder %s1136_s16, %s1332_s4 }
  0x38   :  { %p1142_p12 = pnand %p1140_p11, %p1137_p10 }
  0x3a   :  { %1145 = shalt.err (!%p1142_p12)
}
  0x3b   :  { %s1146_s21 = scalar_lea.vmem %s57_s12, 2048  ;;  %p1151_p0 = scmp.lt.s32.totalorder %s57_s12, %s57_s12 }
  0x3c   :  { %p1147_p13 = scmp.ne.s32.totalorder %s57_s12, %s1146_s21  ;;  %p1152_p1 = scmp.lt.s32.totalorder %s1146_s21, %s1146_s21 }
  0x3e   :  { %p1153_p2 = por %p1152_p1, %p1151_p0 }
  0x40   :  { %p1154_p3 = pnand %p1153_p2, %p1147_p13 }
  0x42   :  { %1157 = shalt.err (!%p1154_p3)
}
  0x43   :  { %62 = dma.hbm_to_vmem [thread:$0]  %s1332_s4, 2048, %s57_s12, [#allocation9], %s1189_s7, %s1189_s7, %s1190_s8  }
  0x44   :  { %1180 = dma.done.wait [#allocation3], 896  }
  0x45   :  { %1181 = vsyncadd [#allocation3], 4294966400 }
  0x46   :  { %1182 = dma.done.wait [#allocation6], 14592  }
  0x47   :  { %1183 = vsyncadd [#allocation6], 4294952704 }
  0x48   :  { %1184 = dma.done.wait [#allocation9], 2048  }
  0x49   :  { %1185 = vsyncadd [#allocation9], 4294965248  ;;  %v100_v0 = vld [vmem:[#allocation5 + $0x80] sm:$0xff]  ;;  %v101_v1 = vld [vmem:[#allocation5 + $0x88] sm:$0xff]  ;;  %vm1195_vm0 = vmmov 0   ;;  %vm182_vm1 = vcmask 130048  }
  0x4a   :  { %v132_v2 = vld [vmem:[#allocation5 + $0x180] sm:$0xff]  ;;  %v909_v3 = vpack.c.bf16 %v101_v1, %v100_v0  ;;  %v133_v4 = vld [vmem:[#allocation5 + $0x188] sm:$0xff]  ;;  %v102_v11 = vld [vmem:[#allocation5 + $0x90] sm:$0xff] }
  0x4b   :  { %v84_v5 = vld [vmem:[#allocation5] sm:$0xff]  ;;  %v85_v6 = vld [vmem:[#allocation5 + $0x8] sm:$0xff]  ;;  %v941_v7 = vpack.c.bf16 %v133_v4, %v132_v2  ;;  %v103_v13 = vld [vmem:[#allocation5 + $0x98] sm:$0xff] }
  0x4c   :  { %v911_v8 = vpack.c.bf16 %v85_v6, %v84_v5  ;;  %v116_v9 = vld [vmem:[#allocation5 + $0x100] sm:$0xff]  ;;  %v117_v10 = vld [vmem:[#allocation5 + $0x108] sm:$0xff]  ;;  %910 = vmatprep.subr.bf16.mxu0 %v909_v3  ;;  %v134_v14 = vld [vmem:[#allocation5 + $0x190] sm:$0xff]  ;;  %v913_v16 = vpack.c.bf16 %v103_v13, %v102_v11 }
  0x4d   :  { %v943_v12 = vpack.c.bf16 %v117_v10, %v116_v9  ;;  %v135_v15 = vld [vmem:[#allocation5 + $0x198] sm:$0xff]  ;;  %942 = vmatprep.subr.bf16.mxu1 %v941_v7  ;;  %v86_v18 = vld [vmem:[#allocation5 + $0x10] sm:$0xff]  ;;  %v104_v23 = vld [vmem:[#allocation5 + $0xa0] sm:$0xff] }
  0x4e   :  { %912 = vmatpush3.bf16.msra.mxu0 %v911_v8  ;;  %v945_v17 = vpack.c.bf16 %v135_v15, %v134_v14  ;;  %v87_v19 = vld [vmem:[#allocation5 + $0x18] sm:$0xff]  ;;  %v118_v20 = vld [vmem:[#allocation5 + $0x110] sm:$0xff]  ;;  %v105_v24 = vld [vmem:[#allocation5 + $0xa8] sm:$0xff] }
  0x4f   :  { %944 = vmatpush3.bf16.msra.mxu1 %v943_v12  ;;  %v915_v21 = vpack.c.bf16 %v87_v19, %v86_v18  ;;  %v119_v22 = vld [vmem:[#allocation5 + $0x118] sm:$0xff]  ;;  %914 = vmatprep.subr.bf16.mxu0 %v913_v16  ;;  %v917_v26 = vpack.c.bf16 %v105_v24, %v104_v23  ;;  %v136_v27 = vld [vmem:[#allocation5 + $0x1a0] sm:$0xff]  ;;  %v137_v28 = vld [vmem:[#allocation5 + $0x1a8] sm:$0xff] }
  0x50   :  { %946 = vmatprep.subr.bf16.mxu1 %v945_v17  ;;  %v947_v25 = vpack.c.bf16 %v119_v22, %v118_v20  ;;  %v88_v29 = vld [vmem:[#allocation5 + $0x20] sm:$0xff]  ;;  %v949_v30 = vpack.c.bf16 %v137_v28, %v136_v27  ;;  %v89_v31 = vld [vmem:[#allocation5 + $0x28] sm:$0xff]  ;;  %v106_v35 = vld [vmem:[#allocation5 + $0xb0] sm:$0xff] }
  0x51   :  { %v120_v32 = vld [vmem:[#allocation5 + $0x120] sm:$0xff]  ;;  %v121_v33 = vld [vmem:[#allocation5 + $0x128] sm:$0xff]  ;;  %v919_v34 = vpack.c.bf16 %v89_v31, %v88_v29  ;;  %v107_v36 = vld [vmem:[#allocation5 + $0xb8] sm:$0xff] }
  0x52   :  { %916 = vmatpush3.bf16.msra.mxu0 %v915_v21  ;;  %v138_v37 = vld [vmem:[#allocation5 + $0x1b0] sm:$0xff]  ;;  %v951_v38 = vpack.c.bf16 %v121_v33, %v120_v32  ;;  %v921_v39 = vpack.c.bf16 %v107_v36, %v106_v35  ;;  %v139_v40 = vld [vmem:[#allocation5 + $0x1b8] sm:$0xff]  ;;  %v108_v46 = vld [vmem:[#allocation5 + $0xc0] sm:$0xff] }
  0x53   :  { %948 = vmatpush3.bf16.msra.mxu1 %v947_v25  ;;  %918 = vmatprep.subr.bf16.mxu0 %v917_v26  ;;  %v90_v41 = vld [vmem:[#allocation5 + $0x30] sm:$0xff]  ;;  %v91_v42 = vld [vmem:[#allocation5 + $0x38] sm:$0xff]  ;;  %v953_v43 = vpack.c.bf16 %v139_v40, %v138_v37  ;;  %v109_v47 = vld [vmem:[#allocation5 + $0xc8] sm:$0xff] }
  0x54   :  { %950 = vmatprep.subr.bf16.mxu1 %v949_v30  ;;  %v122_v44 = vld [vmem:[#allocation5 + $0x130] sm:$0xff]  ;;  %v123_v45 = vld [vmem:[#allocation5 + $0x138] sm:$0xff]  ;;  %v140_v48 = vld [vmem:[#allocation5 + $0x1c0] sm:$0xff]  ;;  %v923_v50 = vpack.c.bf16 %v91_v42, %v90_v41  ;;  %v925_v52 = vpack.c.bf16 %v109_v47, %v108_v46 }
  0x55   :  { %v141_v49 = vld [vmem:[#allocation5 + $0x1c8] sm:$0xff]  ;;  %v955_v51 = vpack.c.bf16 %v123_v45, %v122_v44  ;;  %v92_v53 = vld [vmem:[#allocation5 + $0x40] sm:$0xff]  ;;  %v110_v58 = vld [vmem:[#allocation5 + $0xd0] sm:$0xff] }
  0x56   :  { %920 = vmatpush3.bf16.msra.mxu0 %v919_v34  ;;  %v93_v54 = vld [vmem:[#allocation5 + $0x48] sm:$0xff]  ;;  %v124_v55 = vld [vmem:[#allocation5 + $0x140] sm:$0xff]  ;;  %v957_v56 = vpack.c.bf16 %v141_v49, %v140_v48  ;;  %v111_v59 = vld [vmem:[#allocation5 + $0xd8] sm:$0xff] }
  0x57   :  { %952 = vmatpush3.bf16.msra.mxu1 %v951_v38  ;;  %922 = vmatprep.subr.bf16.mxu0 %v921_v39  ;;  %v125_v57 = vld [vmem:[#allocation5 + $0x148] sm:$0xff]  ;;  %v142_v60 = vld [vmem:[#allocation5 + $0x1d0] sm:$0xff]  ;;  %v143_v61 = vld [vmem:[#allocation5 + $0x1d8] sm:$0xff]  ;;  %v927_v62 = vpack.c.bf16 %v93_v54, %v92_v53  ;;  %v929_v0 = vpack.c.bf16 %v111_v59, %v110_v58 }
  0x58   :  { %954 = vmatprep.subr.bf16.mxu1 %v953_v43  ;;  %v959_v63 = vpack.c.bf16 %v125_v57, %v124_v55  ;;  %v94_v1 = vld [vmem:[#allocation5 + $0x50] sm:$0xff]  ;;  %v95_v2 = vld [vmem:[#allocation5 + $0x58] sm:$0xff]  ;;  %v961_v4 = vpack.c.bf16 %v143_v61, %v142_v60  ;;  %v112_v6 = vld [vmem:[#allocation5 + $0xe0] sm:$0xff]  ;;  %v1196_v60 = vmov 0.0  }
  0x59   :  { %v126_v3 = vld [vmem:[#allocation5 + $0x150] sm:$0xff]  ;;  %v127_v5 = vld [vmem:[#allocation5 + $0x158] sm:$0xff]  ;;  %v113_v7 = vld [vmem:[#allocation5 + $0xe8] sm:$0xff]  ;;  %v931_v10 = vpack.c.bf16 %v95_v2, %v94_v1 }
  0x5a   :  { %924 = vmatpush3.bf16.msra.mxu0 %v923_v50  ;;  %v144_v8 = vld [vmem:[#allocation5 + $0x1e0] sm:$0xff]  ;;  %v145_v9 = vld [vmem:[#allocation5 + $0x1e8] sm:$0xff]  ;;  %v963_v13 = vpack.c.bf16 %v127_v5, %v126_v3  ;;  %v933_v14 = vpack.c.bf16 %v113_v7, %v112_v6  ;;  %v78_v16 = vld [vmem:[#allocation2 + $0x8] sm:$0xff]  ;;  %v1194_v50 = vmov 0.0|0.0  }
  0x5b   :  { %956 = vmatpush3.bf16.msra.mxu1 %v955_v51  ;;  %926 = vmatprep.subr.bf16.mxu0 %v925_v52  ;;  %v96_v11 = vld [vmem:[#allocation5 + $0x60] sm:$0xff]  ;;  %v97_v12 = vld [vmem:[#allocation5 + $0x68] sm:$0xff]  ;;  %v965_v18 = vpack.c.bf16 %v145_v9, %v144_v8  ;;  %v114_v20 = vld [vmem:[#allocation5 + $0xf0] sm:$0xff] }
  0x5c   :  { %958 = vmatprep.subr.bf16.mxu1 %v957_v56  ;;  %v128_v15 = vld [vmem:[#allocation5 + $0x160] sm:$0xff]  ;;  %v129_v19 = vld [vmem:[#allocation5 + $0x168] sm:$0xff]  ;;  %v115_v21 = vld [vmem:[#allocation5 + $0xf8] sm:$0xff]  ;;  %250 = vmatprep.mubr.f32.mxu0 %v78_v16  ;;  %v935_v24 = vpack.c.bf16 %v97_v12, %v96_v11 }
  0x5d   :  { %v80_v17 = vld [vmem:[#allocation2 + $0x18] sm:$0xff]  ;;  %v146_v22 = vld [vmem:[#allocation5 + $0x1f0] sm:$0xff]  ;;  %v147_v23 = vld [vmem:[#allocation5 + $0x1f8] sm:$0xff]  ;;  %v967_v25 = vpack.c.bf16 %v129_v19, %v128_v15  ;;  %v937_v26 = vpack.c.bf16 %v115_v21, %v114_v20 }
  0x5e   :  { %928 = vmatpush3.bf16.msra.mxu0 %v927_v62  ;;  %320 = vmatprep.mubr.f32.mxu1 %v80_v17  ;;  %v98_v27 = vld [vmem:[#allocation5 + $0x70] sm:$0xff]  ;;  %v99_v28 = vld [vmem:[#allocation5 + $0x78] sm:$0xff]  ;;  %v969_v30 = vpack.c.bf16 %v147_v23, %v146_v22  ;;  %v164_v32 = vld [vmem:[#allocation5 + $0x280] sm:$0xff] }
  0x5f   :  { %960 = vmatpush3.bf16.msra.mxu1 %v959_v63  ;;  %930 = vmatprep.subr.bf16.mxu0 %v929_v0  ;;  %v130_v29 = vld [vmem:[#allocation5 + $0x170] sm:$0xff]  ;;  %v131_v31 = vld [vmem:[#allocation5 + $0x178] sm:$0xff]  ;;  %v165_v33 = vld [vmem:[#allocation5 + $0x288] sm:$0xff]  ;;  %v939_v34 = vpack.c.bf16 %v99_v28, %v98_v27 }
  0x60   :  { %962 = vmatprep.subr.bf16.mxu1 %v961_v4  ;;  %v971_v35 = vpack.c.bf16 %v131_v31, %v130_v29  ;;  %v973_v36 = vpack.c.bf16 %v165_v33, %v164_v32  ;;  %v148_v37 = vld [vmem:[#allocation5 + $0x200] sm:$0xff]  ;;  %v149_v38 = vld [vmem:[#allocation5 + $0x208] sm:$0xff]  ;;  %v166_v39 = vld [vmem:[#allocation5 + $0x290] sm:$0xff] }
  0x61   :  { %v167_v40 = vld [vmem:[#allocation5 + $0x298] sm:$0xff]  ;;  %v77_v41 = vld [vmem:[#allocation2] sm:$0xff]  ;;  %v975_v43 = vpack.c.bf16 %v149_v38, %v148_v37  ;;  %v150_v44 = vld [vmem:[#allocation5 + $0x210] sm:$0xff] }
  0x62   :  { %932 = vmatpush3.bf16.msra.mxu0 %v931_v10  ;;  %v79_v42 = vld [vmem:[#allocation2 + $0x10] sm:$0xff]  ;;  %v977_v45 = vpack.c.bf16 %v167_v40, %v166_v39  ;;  %v168_v47 = vld [vmem:[#allocation5 + $0x2a0] sm:$0xff]  ;;  %v169_v48 = vld [vmem:[#allocation5 + $0x2a8] sm:$0xff] }
  0x63   :  { %964 = vmatpush3.bf16.msra.mxu1 %v963_v13  ;;  %934 = vmatprep.subr.bf16.mxu0 %v933_v14  ;;  %v151_v46 = vld [vmem:[#allocation5 + $0x218] sm:$0xff]  ;;  %v82_v49 = vld [vmem:[#allocation2 + $0x28] sm:$0xff]  ;;  %v180_v51 = vld [vmem:[#allocation5 + $0x300] sm:$0xff]  ;;  %v981_v55 = vpack.c.bf16 %v169_v48, %v168_v47 }
  0x64   :  { %966 = vmatprep.subr.bf16.mxu1 %v965_v18  ;;  %v181_v52 = vld [vmem:[#allocation5 + $0x308] sm:$0xff]  ;;  %v979_v54 = vpack.c.bf16 %v151_v46, %v150_v44  ;;  %v152_v56 = vld [vmem:[#allocation5 + $0x220] sm:$0xff]  ;;  %v170_v58 = vld [vmem:[#allocation5 + $0x2b0] sm:$0xff] }
  0x65   :  { %v1006_v53 = vpack.c.bf16 %v181_v52, %v180_v51  ;;  %v153_v57 = vld [vmem:[#allocation5 + $0x228] sm:$0xff]  ;;  %v171_v59 = vld [vmem:[#allocation5 + $0x2b8] sm:$0xff]  ;;  %v154_v0 = vld [vmem:[#allocation5 + $0x230] sm:$0xff] }
  0x66   :  { %936 = vmatpush3.bf16.msra.mxu0 %v935_v24  ;;  %v83_v61 = vld [vmem:[#allocation2 + $0x30] sm:$0xff]  ;;  %v983_v62 = vpack.c.bf16 %v153_v57, %v152_v56  ;;  %v985_v63 = vpack.c.bf16 %v171_v59, %v170_v58  ;;  %v172_v2 = vld [vmem:[#allocation5 + $0x2c0] sm:$0xff]  ;;  %v173_v3 = vld [vmem:[#allocation5 + $0x2c8] sm:$0xff] }
  0x67   :  { %968 = vmatpush3.bf16.msra.mxu1 %v967_v25  ;;  %938 = vmatprep.subr.bf16.mxu0 %v937_v26  ;;  %v155_v1 = vld [vmem:[#allocation5 + $0x238] sm:$0xff]  ;;  %v989_v5 = vpack.c.bf16 %v173_v3, %v172_v2  ;;  %v156_v6 = vld [vmem:[#allocation5 + $0x240] sm:$0xff]  ;;  %v157_v7 = vld [vmem:[#allocation5 + $0x248] sm:$0xff] }
  0x68   :  { %970 = vmatprep.subr.bf16.mxu1 %v969_v30  ;;  %v987_v4 = vpack.c.bf16 %v155_v1, %v154_v0  ;;  %v174_v8 = vld [vmem:[#allocation5 + $0x2d0] sm:$0xff]  ;;  %v175_v9 = vld [vmem:[#allocation5 + $0x2d8] sm:$0xff]  ;;  %v991_v10 = vpack.c.bf16 %v157_v7, %v156_v6  ;;  %v176_v14 = vld [vmem:[#allocation5 + $0x2e0] sm:$0xff] }
  0x69   :  { %v993_v11 = vpack.c.bf16 %v175_v9, %v174_v8  ;;  %v158_v12 = vld [vmem:[#allocation5 + $0x250] sm:$0xff]  ;;  %v159_v13 = vld [vmem:[#allocation5 + $0x258] sm:$0xff]  ;;  %v177_v15 = vld [vmem:[#allocation5 + $0x2e8] sm:$0xff] }
  0x6a   :  { %940 = vmatpush3.bf16.msra.mxu0 %v939_v34  ;;  %v995_v16 = vpack.c.bf16 %v159_v13, %v158_v12  ;;  %v997_v17 = vpack.c.bf16 %v177_v15, %v176_v14  ;;  %v160_v18 = vld [vmem:[#allocation5 + $0x260] sm:$0xff]  ;;  %v161_v19 = vld [vmem:[#allocation5 + $0x268] sm:$0xff]  ;;  %v178_v20 = vld [vmem:[#allocation5 + $0x2f0] sm:$0xff] }
  0x6b   :  { %972 = vmatpush3.bf16.msra.mxu1 %v971_v35  ;;  %974 = vmatprep.subr.bf16.mxu0 %v973_v36  ;;  %v179_v21 = vld [vmem:[#allocation5 + $0x2f8] sm:$0xff]  ;;  %v999_v22 = vpack.c.bf16 %v161_v19, %v160_v18  ;;  %v162_v24 = vld [vmem:[#allocation5 + $0x270] sm:$0xff]  ;;  %v81_v27 = vld [vmem:[#allocation2 + $0x20] sm:$0xff] }
  0x6c   :  { %1005 = vmatprep.subr.bf16.mxu1 %v1194_v50  ;;  %v1001_v23 = vpack.c.bf16 %v179_v21, %v178_v20  ;;  %v163_v25 = vld [vmem:[#allocation5 + $0x278] sm:$0xff]  ;;  %v472_v28 = vld [vmem:[#allocation7] sm:$0xff]  ;;  %v474_v30 = vld [vmem:[#allocation7 + $0x10] sm:$0xff] }
  0x6d   :  { %251 = vmatmul.mubr.f32.vlgmr.msra.gmra.mrb[0].mxu0 %v77_v41  ;;  %v1003_v26 = vpack.c.bf16 %v163_v25, %v162_v24  ;;  %v473_v29 = vld [vmem:[#allocation7 + $0x8] sm:$0xff]  ;;  %v475_v32 = vld [vmem:[#allocation7 + $0x18] sm:$0xff]  ;;  %v476_v34 = vld [vmem:[#allocation7 + $0x20] sm:$0xff] }
  0x6e   :  { %321 = vmatmul.mubr.f32.vlgmr.msra.gmra.mrb[0].mxu1 %v79_v42  ;;  %976 = vmatpush3.bf16.msra.mxu0 %v975_v43  ;;  %v1009_v31 = vpack.c.bf16 %v473_v29, %v472_v28  ;;  %v1012_v33 = vpack.c.bf16 %v475_v32, %v474_v30  ;;  %v477_v35 = vld [vmem:[#allocation7 + $0x28] sm:$0xff]  ;;  %v478_v37 = vld [vmem:[#allocation7 + $0x30] sm:$0xff]  ;;  %v479_v38 = vld [vmem:[#allocation7 + $0x38] sm:$0xff] }
  0x6f   :  { %978 = vmatprep.subr.bf16.mxu0 %v977_v45  ;;  %390 = vmatprep.mubr.f32.mxu0 %v82_v49  ;;  %v1015_v36 = vpack.c.bf16 %v477_v35, %v476_v34  ;;  %v1018_v39 = vpack.c.bf16 %v479_v38, %v478_v37  ;;  %v480_v40 = vld [vmem:[#allocation7 + $0x40] sm:$0xff]  ;;  %v481_v41 = vld [vmem:[#allocation7 + $0x48] sm:$0xff]  ;;  %v482_v43 = vld [vmem:[#allocation7 + $0x50] sm:$0xff] }
  0x70   :  { %1007 = vmatpush3.bf16.msra.mxu1 %v1006_v53  ;;  %836 = vmatprep.mubr.msk.f32.mxu1 %vm1195_vm0, %v1196_v60  ;;  %v1021_v42 = vpack.c.bf16 %v481_v41, %v480_v40  ;;  %v483_v44 = vld [vmem:[#allocation7 + $0x58] sm:$0xff]  ;;  %v484_v46 = vld [vmem:[#allocation7 + $0x60] sm:$0xff]  ;;  %v485_v47 = vld [vmem:[#allocation7 + $0x68] sm:$0xff] }
  0x71   :  { %1008 = vmatprep.subr.bf16.mxu1 %v1194_v50  ;;  %v1024_v45 = vpack.c.bf16 %v483_v44, %v482_v43  ;;  %v1027_v48 = vpack.c.bf16 %v485_v47, %v484_v46  ;;  %v486_v49 = vld [vmem:[#allocation7 + $0x70] sm:$0xff]  ;;  %v487_v51 = vld [vmem:[#allocation7 + $0x78] sm:$0xff]  ;;  %v566_v53 = vld [vmem:[#allocation8] sm:$0xff] }
  0x72   :  { %980 = vmatpush3.bf16.msra.mxu0 %v979_v54  ;;  %v1030_v52 = vpack.c.bf16 %v487_v51, %v486_v49  ;;  %v567_v54 = vld [vmem:[#allocation8 + $0x8] sm:$0xff]  ;;  %v569_v57 = vld [vmem:[#allocation8 + $0x18] sm:$0xff]  ;;  %v570_v59 = vld [vmem:[#allocation8 + $0x20] sm:$0xff] }
  0x73   :  { %982 = vmatprep.subr.bf16.mxu0 %v981_v55  ;;  %837 = vmatmul.mubr.msk.f32.vlgmr.msra.gmra.mrb[2].mxu1 %vm182_vm1, %v83_v61  ;;  %v568_v55 = vld [vmem:[#allocation8 + $0x10] sm:$0xff]  ;;  %v1033_v56 = vpack.c.bf16 %v567_v54, %v566_v53  ;;  %v574_v1 = vld [vmem:[#allocation8 + $0x40] sm:$0xff]  ;;  %v575_v2 = vld [vmem:[#allocation8 + $0x48] sm:$0xff] }
  0x74   :  { %871 = vmatprep.mubr.msk.f32.mxu1 %vm1195_vm0, %v1196_v60  ;;  %1010 = vmatpush3.bf16.msra.mxu1 %v1009_v31  ;;  %v1036_v58 = vpack.c.bf16 %v569_v57, %v568_v55  ;;  %v1045_v3 = vpack.c.bf16 %v575_v2, %v574_v1  ;;  %v578_v7 = vld [vmem:[#allocation8 + $0x60] sm:$0xff]  ;;  %v579_v8 = vld [vmem:[#allocation8 + $0x68] sm:$0xff]  ;;  %v580_v29 = vld [vmem:[#allocation8 + $0x70] sm:$0xff] }
  0x75   :  { %1011 = vmatprep.subr.bf16.mxu1 %v1194_v50  ;;  %v1051_v9 = vpack.c.bf16 %v579_v8, %v578_v7  ;;  %v581_v30 = vld [vmem:[#allocation8 + $0x78] sm:$0xff] }
  0x76   :  { %984 = vmatpush3.bf16.msra.mxu0 %v983_v62  ;;  %v572_v62 = vld [vmem:[#allocation8 + $0x30] sm:$0xff]  ;;  %v1054_v31 = vpack.c.bf16 %v581_v30, %v580_v29  ;;  %v688_v32 = vld [vmem:[%s1331_s3] ss:$0 sm:$0xff]  ;;  %s1197_s3 = smov [#allocation10]  }
  0x77   :  { %986 = vmatprep.subr.bf16.mxu0 %v985_v63  ;;  %v573_v63 = vld [vmem:[#allocation8 + $0x38] sm:$0xff]  ;;  %s676_s22 = sshll.u32 %s1197_s3, 4  ;;  %s677_s22 = int_to_ptr.vmem [resolvable:$true] %s676_s22 }
  0x78   :  { %1013 = vmatpush3.bf16.msra.mxu1 %v1012_v33  ;;  %v1042_v0 = vpack.c.bf16 %v573_v63, %v572_v62  ;;  %v689_v37 = vld [vmem:[%s1333_s5] ss:$0 sm:$0xff]  ;;  %s1158_s5 = scalar_lea.vmem %s677_s22, 128  ;;  %p1163_p5 = scmp.lt.s32.totalorder %s677_s22, %s677_s22 }
  0x79   :  { %1014 = vmatprep.subr.bf16.mxu1 %v1194_v50  ;;  %p1159_p4 = scmp.ne.s32.totalorder %s677_s22, %s1158_s5  ;;  %p1164_p6 = scmp.lt.s32.totalorder %s1158_s5, %s1158_s5 }
  0x7a   :  { %988 = vmatpush3.bf16.msra.mxu0 %v987_v4  ;;  %v576_v4 = vld [vmem:[#allocation8 + $0x50] sm:$0xff] }
  0x7b   :  { %990 = vmatprep.subr.bf16.mxu0 %v989_v5  ;;  %v577_v5 = vld [vmem:[#allocation8 + $0x58] sm:$0xff]  ;;  %p1165_p7 = por %p1164_p6, %p1163_p5 }
  0x7c   :  { %1016 = vmatpush3.bf16.msra.mxu1 %v1015_v36  ;;  %v1048_v6 = vpack.c.bf16 %v577_v5, %v576_v4 }
  0x7d   :  { %1017 = vmatprep.subr.bf16.mxu1 %v1194_v50  ;;  %p1166_p8 = pnand %p1165_p7, %p1159_p4 }
  0x7e   :  { %992 = vmatpush3.bf16.msra.mxu0 %v991_v10 }
  0x7f   :  { %994 = vmatprep.subr.bf16.mxu0 %v993_v11 }
  0x80   :  { %1019 = vmatpush3.bf16.msra.mxu1 %v1018_v39 }
  0x81   :  { %1020 = vmatprep.subr.bf16.mxu1 %v1194_v50 }
  0x82   :  { %996 = vmatpush3.bf16.msra.mxu0 %v995_v16 }
  0x83   :  { %998 = vmatprep.subr.bf16.mxu0 %v997_v17 }
  0x84   :  { %1022 = vmatpush3.bf16.msra.mxu1 %v1021_v42 }
  0x85   :  { %1023 = vmatprep.subr.bf16.mxu1 %v1194_v50 }
  0x86   :  { %1000 = vmatpush3.bf16.msra.mxu0 %v999_v22 }
  0x87   :  { %1002 = vmatprep.subr.bf16.mxu0 %v1001_v23 }
  0x88   :  { %1025 = vmatpush3.bf16.msra.mxu1 %v1024_v45 }
  0x89   :  { %1026 = vmatprep.subr.bf16.mxu1 %v1194_v50 }
  0x8a   :  { %1004 = vmatpush3.bf16.msra.mxu0 %v1003_v26 }
  0x8b   :  { %1032 = vmatprep.subr.bf16.mxu0 %v1194_v50 }
  0x8c   :  { %1028 = vmatpush3.bf16.msra.mxu1 %v1027_v48 }
  0x8d   :  { %391 = vmatmul.mubr.f32.vlgmr.msra.gmra.mrb[2].mxu0 %v81_v27  ;;  %1029 = vmatprep.subr.bf16.mxu1 %v1194_v50 }
  0x8e   :  { %906 = vmatprep.mubr.msk.f32.mxu0 %vm1195_vm0, %v1196_v60  ;;  %1034 = vmatpush3.bf16.msra.mxu0 %v1033_v56  ;;  %v571_v60 = vld [vmem:[#allocation8 + $0x28] sm:$0xff] }
  0x8f   :  { %1035 = vmatprep.subr.bf16.mxu0 %v1194_v50  ;;  %v1039_v61 = vpack.c.bf16 %v571_v60, %v570_v59 }
  0x90   :  { %1031 = vmatpush3.bf16.msra.mxu1 %v1030_v52 }
  0x92   :  { %1037 = vmatpush3.bf16.msra.mxu0 %v1036_v58 }
  0x93   :  { %1038 = vmatprep.subr.bf16.mxu0 %v1194_v50 }
  0x96   :  { %1040 = vmatpush3.bf16.msra.mxu0 %v1039_v61 }
  0x97   :  { %1041 = vmatprep.subr.bf16.mxu0 %v1194_v50 }
  0x9a   :  { %1043 = vmatpush3.bf16.msra.mxu0 %v1042_v0 }
  0x9b   :  { %1044 = vmatprep.subr.bf16.mxu0 %v1194_v50 }
  0x9e   :  { %1046 = vmatpush3.bf16.msra.mxu0 %v1045_v3 }
  0x9f   :  { %1047 = vmatprep.subr.bf16.mxu0 %v1194_v50 }
  0xa2   :  { %1049 = vmatpush3.bf16.msra.mxu0 %v1048_v6 }
  0xa3   :  { %1050 = vmatprep.subr.bf16.mxu0 %v1194_v50 }
  0xa6   :  { %1052 = vmatpush3.bf16.msra.mxu0 %v1051_v9 }
  0xa7   :  { %1053 = vmatprep.subr.bf16.mxu0 %v1194_v50 }
  0xaa   :  { %1055 = vmatpush3.bf16.msra.mxu0 %v1054_v31 }
 0x140   :  { %v722_v10 = vpop.f32.mrb[0].mxu0 }
 0x141   :  { %v757_v11 = vpop.f32.mrb[0].mxu1  ;;  %v723_v12 = vpop.f32.mrb[1].mxu0 }
 0x142   :  { %v724_v13 = vadd.f32 %v723_v12, %v722_v10  ;;  %v758_v14 = vpop.f32.mrb[1].mxu1 }
 0x143   :  { %v759_v15 = vadd.f32 %v758_v14, %v757_v11 }
 0x145   :  { %v323_v16 = vadd.f32 %v759_v15, %v724_v13 }
 0x146   :  { %v462_v17 = vpop.f32.mrb[2].mxu1 }
 0x147   :  { %v838_v18 = vpop.f32.mrb[3].mxu1 }
 0x160   :  { %v792_v19 = vpop.f32.mrb[2].mxu0 }
 0x161   :  { %v793_v20 = vpop.f32.mrb[3].mxu0 }
 0x162   :  { %v794_v21 = vadd.f32 %v793_v20, %v792_v19 }
 0x164   :  { %v393_v22 = vadd.f32 %v794_v21, %v323_v16 }
 0x166   :  { %v463_v23 = vadd.f32 %v462_v17, %v393_v22 }
 0x168   :  { %v466_v24 = vmul.f32 0.001, %v463_v23 }
 0x16a   :  { %v467_v25 = vadd.f32 0.001, %v466_v24  ;;  %v468_v26 = vmul.f32 %v466_v24, %v466_v24 }
 0x16c   :  { %v469_v27 = vadd.f32 %v468_v26, %v467_v25  ;;  %v470_v28 = vmul.f32 %v468_v26, %v466_v24 }
 0x16e   :  { %v471_v50 = vadd.f32 %v470_v28, %v469_v27 }
 0x170   :  { %872 = vmatmul.mubr.f32.vlgmr.msra.gmra.mrb[4].mxu1 %v471_v50 }
 0x243   :  { %v561_v33 = vpop.f32.mrb[4].mxu1 }
 0x244   :  { %v562_v34 = vadd.f32 %v688_v32, %v561_v33  ;;  %v873_v35 = vpop.f32.mrb[5].mxu1 }
 0x246   :  { %v565_v36 = vmax.f32 %v562_v34, 0.0 }
 0x248   :  { %907 = vmatmul.mubr.f32.vlgmr.msra.gmra.mrb[4].mxu0 %v565_v36 }
 0x31b   :  { %v655_v38 = vpop.f32.mrb[4].mxu0 }
 0x31c   :  { %v656_v39 = vadd.f32 %v689_v37, %v655_v38  ;;  %v908_v40 = vpop.f32.mrb[5].mxu0 }
 0x31e   :  { %659 = vmax.xlane.f32.xlu0 %v656_v39 }
 0x3ab   :  { %v660_v41 = vpop.xlane.xlu0 %659 }
 0x3ac   :  { %v661_v42 = vsub.f32 %v656_v39, %v660_v41 }
 0x3ae   :  { %v662_v43 = vmul.f32 1.442695, %v661_v42 }
 0x3b0   :  { %1066 = vpow2.f32 %v662_v43 }
 0x3ba   :  { %v1067_v44 = vpop.eup %1066 }
 0x3bb   :  { %664 = vadd.xlane.f32.xlu0 %v1067_v44 }
 0x448   :  { %v665_v45 = vpop.xlane.xlu0 %664 }
 0x449   :  { %1068 = vlog2.f32 %v665_v45 }
 0x453   :  { %v1069_v46 = vpop.eup %1068 }
 0x454   :  { %v667_v47 = vmul.f32 0.6931472, %v1069_v46 }
 0x456   :  { %v668_v48 = vsub.f32 %v661_v42, %v667_v47 }
 0x458   :  { %669 = vst [vmem:[#allocation10] sm:$0xff] %v668_v48 }
 0x459   :  { %1169 = shalt.err (!%p1166_p8)
}
 0x45a   :  { %s1170_s25 = scalar_lea.hbm %s1334_s6, 128 }
 0x45b   :  { %p1171_p9 = scmp.ne.s32.totalorder %s1334_s6, %s1170_s25  ;;  %p1174_p10 = scmp.lt.u32.totalorder %s1170_s25, %s1334_s6 }
 0x45d   :  { %p1176_p11 = pnand %p1174_p10, %p1171_p9 }
 0x45f   :  { %1179 = shalt.err (!%p1176_p11)
}
 0x460   :  { %679 = dma.vmem_to_hbm [thread:$0]  %s677_s22, 128, %s1334_s6, [#allocation4]  }
 0x461   :  { %1186 = dma.done.wait [#allocation4], 128  }
 0x462   :  { %1187 = vsyncadd [#allocation4], 4294967168 }
 0x463   :  { %683 = vsyncpa [#allocation3], 1 }
 0x464   :  { %684 = vsyncpa [#allocation6], 1 }
 0x465   :  { %685 = vsyncpa [#allocation9], 1 }
 0x466   :  { %686 = vsyncpa [#allocation4], 1 }

</bundles_post_ra>
